<compile_context>
chip_gen: v6e
topology: v6e:2x2x1
jax: 0.10.0
libtpu: 0.0.40
codegen_flags: <defaults>
</compile_context>

<pallas_src>
import jax
import jax.numpy as jnp
from jax.experimental import pallas as pl
from jax.experimental.pallas import tpu as pltpu


def _round_up(n, m):
    return ((n + m - 1) // m) * m


def dqn_kernel(x_ref, w1_ref, w2_ref, w3_ref, b1_ref, b2_ref, b3_ref, out_ref):
    n_obs = x_ref.shape[1]
    n_actions = out_ref.shape[1]

    x = x_ref[...]                                     # (TB, n_obs) f32

    # ---- layer 1 + ReLU: n_obs is tiny (~4), so do a statically-unrolled
    # broadcast-MAC on the VPU instead of a degenerate small-K MXU matmul.
    acc = b1_ref[...]                                  # (1, hidden) f32
    for k in range(n_obs):                             # static unroll
        acc = acc + x[:, k:k + 1] * w1_ref[k:k + 1, :]
    h1 = jnp.maximum(acc, 0.0).astype(w2_ref.dtype)    # (TB, hidden) bf16

    # ---- layer 2 + ReLU: bf16 MXU matmul, f32 accumulate, f32 epilogue.
    h2 = jnp.dot(h1, w2_ref[...], preferred_element_type=jnp.float32)
    h2 = jnp.maximum(h2 + b2_ref[...], 0.0).astype(w3_ref.dtype)

    # ---- layer 3: full-width (hidden x 128-padded) MXU matmul; store only the
    # n_actions live lanes (tiny masked store beats 64x padded writeback).
    out = jnp.dot(h2, w3_ref[...], preferred_element_type=jnp.float32)
    out_ref[...] = (out[:, :n_actions] + b3_ref[...]).astype(out_ref.dtype)


def prepare_params(params):
    """One-time prep (re-run only when weights change): bf16 casts + lane padding
    are hoisted out of the per-call forward path."""
    w3 = params["w3"]
    _, n_actions = w3.shape
    n_pad = _round_up(max(n_actions, 8), 128)
    return {
        "w1": params["w1"].astype(jnp.float32),              # (n_obs, hidden), tiny -> f32
        "w2": params["w2"].astype(jnp.bfloat16),              # (hidden, hidden)
        "w3": jnp.pad(w3, ((0, 0), (0, n_pad - n_actions))).astype(jnp.bfloat16),
        "b1": params["b1"].astype(jnp.float32),
        "b2": params["b2"].astype(jnp.float32),
        "b3": params["b3"].astype(jnp.float32),
    }


def dqn_forward(x, prep):
    """x: (B, n_obs) f32. prep: output of prepare_params."""
    w1, w2, w3 = prep["w1"], prep["w2"], prep["w3"]
    b1, b2, b3 = prep["b1"], prep["b2"], prep["b3"]

    B, n_obs = x.shape
    hidden = w2.shape[0]
    n_pad = w3.shape[1]
    n_actions = b3.shape[1]

    # Grid choice: single step unless the batch is a big replay batch, in which
    # case 2 equal tiles let the "parallel" axis use both TCs on v7x.
    if B >= 512:
        num_tiles = 2
        TB = _round_up(pl.cdiv(B, 2), 8)
    else:
        num_tiles = 1
        TB = B                      # block == full array dim -> no alignment pad
    B_pad = TB * num_tiles
    x_in = x if B_pad == B else jnp.pad(x, ((0, B_pad - B), (0, 0)))

    flops = 2 * B_pad * (n_obs * hidden + hidden * hidden + hidden * n_pad)
    bytes_accessed = (x_in.size * 4 + w1.size * 4 + w2.size * 2 + w3.size * 2
                      + (b1.size + b2.size + b3.size) * 4
                      + B_pad * n_actions * 4)

    out = pl.pallas_call(
        dqn_kernel,
        out_shape=jax.ShapeDtypeStruct((B_pad, n_actions), jnp.float32),
        grid=(num_tiles,),
        in_specs=[
            pl.BlockSpec((TB, n_obs), lambda i: (i, 0)),       # x tile (unpadded lanes)
            pl.BlockSpec((n_obs, hidden), lambda i: (0, 0)),   # w1 (resident)
            pl.BlockSpec((hidden, hidden), lambda i: (0, 0)),  # w2 (resident, bf16)
            pl.BlockSpec((hidden, n_pad), lambda i: (0, 0)),   # w3 (resident, bf16, lane-padded)
            pl.BlockSpec((1, hidden), lambda i: (0, 0)),       # b1
            pl.BlockSpec((1, hidden), lambda i: (0, 0)),       # b2
            pl.BlockSpec((1, n_actions), lambda i: (0, 0)),    # b3
        ],
        out_specs=pl.BlockSpec((TB, n_actions), lambda i: (i, 0)),
        compiler_params=pltpu.CompilerParams(
            dimension_semantics=("parallel",),                 # 1 tile/TC on v7x large batches
        ),
        cost_estimate=pl.CostEstimate(
            flops=flops, transcendentals=0, bytes_accessed=bytes_accessed),
    )(x_in, w1, w2, w3, b1, b2, b3)

    return out if B_pad == B else out[:B]


dqn_forward_jit = jax.jit(dqn_forward)


def init_dqn_params(key, n_observations, n_actions, hidden=128):
    """Deterministic init matching torch.nn.Linear default (U[-1/sqrt(fan_in), ...])."""
    ks = jax.random.split(key, 6)

    def linear(kw, kb, fan_in, fan_out):
        bound = 1.0 / jnp.sqrt(jnp.float32(fan_in))
        w = jax.random.uniform(kw, (fan_in, fan_out), jnp.float32, -bound, bound)
        b = jax.random.uniform(kb, (1, fan_out), jnp.float32, -bound, bound)
        return w, b

    w1, b1 = linear(ks[0], ks[1], n_observations, hidden)
    w2, b2 = linear(ks[2], ks[3], hidden, hidden)
    w3, b3 = linear(ks[4], ks[5], hidden, n_actions)
    return {"w1": w1, "b1": b1, "w2": w2, "b2": b2, "w3": w3, "b3": b3}


def dqn_reference(x, p):
    h1 = jnp.maximum(x @ p["w1"] + p["b1"], 0.0)
    h2 = jnp.maximum(h1 @ p["w2"] + p["b2"], 0.0)
    return h2 @ p["w3"] + p["b3"]


if __name__ == "__main__":
    # CartPole-like dims: n_observations=4, n_actions=2.
    n_observations, n_actions = 4, 2

    key = jax.random.PRNGKey(0)
    k_params, k_x1, k_x2 = jax.random.split(key, 3)
    params = init_dqn_params(k_params, n_observations, n_actions)

    # One-time weight prep, hoisted off the per-call path.
    prep = prepare_params(params)

    # Tiny inference-style batch (action selection): single grid step, no padding.
    x_small = jax.random.normal(k_x1, (8, n_observations), jnp.float32)
    out_small = jax.block_until_ready(dqn_forward_jit(x_small, prep))
    ref_small = dqn_reference(x_small, params)
    assert out_small.shape == (8, n_actions)
    assert jnp.allclose(out_small, ref_small, atol=5e-2, rtol=5e-2), \
        "small-batch mismatch vs reference"

    # Replay-buffer-style batch: 2 equal tiles (one per TC on v7x).
    x_big = jax.random.normal(k_x2, (512, n_observations), jnp.float32)
    out_big = jax.block_until_ready(dqn_forward_jit(x_big, prep))
    ref_big = dqn_reference(x_big, params)
    assert out_big.shape == (512, n_actions)
    assert jnp.allclose(out_big, ref_big, atol=5e-2, rtol=5e-2), \
        "large-batch mismatch vs reference"

    print("KERNEL_OK")
</pallas_src>

<mosaic_0001>
module attributes {stable_mosaic.version = 11 : i64} {
  func.func @dqn_kernel(%arg0: i32, %arg1: memref<8x4xf32, #tpu.memory_space<vmem>>, %arg2: memref<4x128xf32, #tpu.memory_space<vmem>>, %arg3: memref<128x128xbf16, #tpu.memory_space<vmem>>, %arg4: memref<128x128xbf16, #tpu.memory_space<vmem>>, %arg5: memref<1x128xf32, #tpu.memory_space<vmem>>, %arg6: memref<1x128xf32, #tpu.memory_space<vmem>>, %arg7: memref<1x2xf32, #tpu.memory_space<vmem>>, %arg8: memref<8x2xf32, #tpu.memory_space<vmem>>) attributes {dimension_semantics = [#tpu.dimension_semantics<parallel>], iteration_bounds = array<i64: 1>, scalar_prefetch = 0 : i64, scratch_operands = 0 : i64, tpu.core_type = #tpu.core_type<tc>, window_params = [{transform_indices = @transform_0, window_bounds = array<i64: 8, 4>}, {pipeline_mode = #tpu.pipeline_mode<synchronous>, transform_indices = @transform_1, window_bounds = array<i64: 4, 128>}, {pipeline_mode = #tpu.pipeline_mode<synchronous>, transform_indices = @transform_2, window_bounds = array<i64: 128, 128>}, {pipeline_mode = #tpu.pipeline_mode<synchronous>, transform_indices = @transform_3, window_bounds = array<i64: 128, 128>}, {pipeline_mode = #tpu.pipeline_mode<synchronous>, transform_indices = @transform_4, window_bounds = array<i64: 1, 128>}, {pipeline_mode = #tpu.pipeline_mode<synchronous>, transform_indices = @transform_5, window_bounds = array<i64: 1, 128>}, {pipeline_mode = #tpu.pipeline_mode<synchronous>, transform_indices = @transform_6, window_bounds = array<i64: 1, 2>}, {transform_indices = @transform_7, window_bounds = array<i64: 8, 2>}]} {
    %c0 = arith.constant 0 : index
    %c0_0 = arith.constant 0 : index
    %0 = vector.load %arg1[%c0, %c0_0] : memref<8x4xf32, #tpu.memory_space<vmem>>, vector<8x4xf32>
    %c0_1 = arith.constant 0 : index
    %c0_2 = arith.constant 0 : index
    %1 = vector.load %arg5[%c0_1, %c0_2] : memref<1x128xf32, #tpu.memory_space<vmem>>, vector<1x128xf32>
    %2 = vector.extract_strided_slice %0 {offsets = [0, 0], sizes = [8, 1], strides = [1, 1]} : vector<8x4xf32> to vector<8x1xf32>
    %c0_3 = arith.constant 0 : index
    %c0_4 = arith.constant 0 : index
    %3 = vector.load %arg2[%c0_3, %c0_4] : memref<4x128xf32, #tpu.memory_space<vmem>>, vector<1x128xf32>
    %4 = vector.broadcast %2 : vector<8x1xf32> to vector<8x128xf32>
    %5 = vector.broadcast %3 : vector<1x128xf32> to vector<8x128xf32>
    %6 = arith.mulf %4, %5 : vector<8x128xf32>
    %7 = vector.broadcast %1 : vector<1x128xf32> to vector<8x128xf32>
    %8 = arith.addf %7, %6 : vector<8x128xf32>
    %9 = vector.extract_strided_slice %0 {offsets = [0, 1], sizes = [8, 1], strides = [1, 1]} : vector<8x4xf32> to vector<8x1xf32>
    %c1 = arith.constant 1 : index
    %c0_5 = arith.constant 0 : index
    %10 = vector.load %arg2[%c1, %c0_5] : memref<4x128xf32, #tpu.memory_space<vmem>>, vector<1x128xf32>
    %11 = vector.broadcast %9 : vector<8x1xf32> to vector<8x128xf32>
    %12 = vector.broadcast %10 : vector<1x128xf32> to vector<8x128xf32>
    %13 = arith.mulf %11, %12 : vector<8x128xf32>
    %14 = arith.addf %8, %13 : vector<8x128xf32>
    %15 = vector.extract_strided_slice %0 {offsets = [0, 2], sizes = [8, 1], strides = [1, 1]} : vector<8x4xf32> to vector<8x1xf32>
    %c2 = arith.constant 2 : index
    %c0_6 = arith.constant 0 : index
    %16 = vector.load %arg2[%c2, %c0_6] : memref<4x128xf32, #tpu.memory_space<vmem>>, vector<1x128xf32>
    %17 = vector.broadcast %15 : vector<8x1xf32> to vector<8x128xf32>
    %18 = vector.broadcast %16 : vector<1x128xf32> to vector<8x128xf32>
    %19 = arith.mulf %17, %18 : vector<8x128xf32>
    %20 = arith.addf %14, %19 : vector<8x128xf32>
    %21 = vector.extract_strided_slice %0 {offsets = [0, 3], sizes = [8, 1], strides = [1, 1]} : vector<8x4xf32> to vector<8x1xf32>
    %c3 = arith.constant 3 : index
    %c0_7 = arith.constant 0 : index
    %22 = vector.load %arg2[%c3, %c0_7] : memref<4x128xf32, #tpu.memory_space<vmem>>, vector<1x128xf32>
    %23 = vector.broadcast %21 : vector<8x1xf32> to vector<8x128xf32>
    %24 = vector.broadcast %22 : vector<1x128xf32> to vector<8x128xf32>
    %25 = arith.mulf %23, %24 : vector<8x128xf32>
    %26 = arith.addf %20, %25 : vector<8x128xf32>
    %cst = arith.constant 0.000000e+00 : f32
    %27 = vector.broadcast %cst : f32 to vector<8x128xf32>
    %28 = arith.maximumf %26, %27 : vector<8x128xf32>
    %29 = arith.truncf %28 : vector<8x128xf32> to vector<8x128xbf16>
    %c0_8 = arith.constant 0 : index
    %c0_9 = arith.constant 0 : index
    %30 = vector.load %arg3[%c0_8, %c0_9] : memref<128x128xbf16, #tpu.memory_space<vmem>>, vector<128x128xbf16>
    %cst_10 = arith.constant dense<0.000000e+00> : vector<8x128xf32>
    %31 = tpu.matmul %29, %30, %cst_10 {dimension_numbers = #tpu.dot_dimension_numbers<[1], [0], [0], [1], [0, 0, 1, 1], [], []>} : vector<8x128xbf16>, vector<128x128xbf16>, vector<8x128xf32> -> vector<8x128xf32>
    %c0_11 = arith.constant 0 : index
    %c0_12 = arith.constant 0 : index
    %32 = vector.load %arg6[%c0_11, %c0_12] : memref<1x128xf32, #tpu.memory_space<vmem>>, vector<1x128xf32>
    %33 = vector.broadcast %32 : vector<1x128xf32> to vector<8x128xf32>
    %34 = arith.addf %31, %33 : vector<8x128xf32>
    %cst_13 = arith.constant 0.000000e+00 : f32
    %35 = vector.broadcast %cst_13 : f32 to vector<8x128xf32>
    %36 = arith.maximumf %34, %35 : vector<8x128xf32>
    %37 = arith.truncf %36 : vector<8x128xf32> to vector<8x128xbf16>
    %c0_14 = arith.constant 0 : index
    %c0_15 = arith.constant 0 : index
    %38 = vector.load %arg4[%c0_14, %c0_15] : memref<128x128xbf16, #tpu.memory_space<vmem>>, vector<128x128xbf16>
    %cst_16 = arith.constant dense<0.000000e+00> : vector<8x128xf32>
    %39 = tpu.matmul %37, %38, %cst_16 {dimension_numbers = #tpu.dot_dimension_numbers<[1], [0], [0], [1], [0, 0, 1, 1], [], []>} : vector<8x128xbf16>, vector<128x128xbf16>, vector<8x128xf32> -> vector<8x128xf32>
    %40 = vector.extract_strided_slice %39 {offsets = [0, 0], sizes = [8, 2], strides = [1, 1]} : vector<8x128xf32> to vector<8x2xf32>
    %c0_17 = arith.constant 0 : index
    %c0_18 = arith.constant 0 : index
    %41 = vector.load %arg7[%c0_17, %c0_18] : memref<1x2xf32, #tpu.memory_space<vmem>>, vector<1x2xf32>
    %42 = vector.broadcast %41 : vector<1x2xf32> to vector<8x2xf32>
    %43 = arith.addf %40, %42 : vector<8x2xf32>
    %c0_19 = arith.constant 0 : index
    %c0_20 = arith.constant 0 : index
    %44 = vector.load %arg8[%c0_19, %c0_20] : memref<8x2xf32, #tpu.memory_space<vmem>>, vector<8x2xf32>
    tpu.vector_store %arg8[%c0_19, %c0_20], %43 {strides = array<i32>} : memref<8x2xf32, #tpu.memory_space<vmem>>, vector<8x2xf32>,
    return
  }
  func.func @transform_0(%arg0: i32) -> (i32, i32) {
    %c0_i32 = arith.constant 0 : i32
    %c0_i32_0 = arith.constant 0 : i32
    return %arg0, %c0_i32 : i32, i32
  }
  func.func @transform_1(%arg0: i32) -> (i32, i32) {
    %c0_i32 = arith.constant 0 : i32
    %c0_i32_0 = arith.constant 0 : i32
    %c0_i32_1 = arith.constant 0 : i32
    return %c0_i32, %c0_i32_0 : i32, i32
  }
  func.func @transform_2(%arg0: i32) -> (i32, i32) {
    %c0_i32 = arith.constant 0 : i32
    %c0_i32_0 = arith.constant 0 : i32
    %c0_i32_1 = arith.constant 0 : i32
    return %c0_i32, %c0_i32_0 : i32, i32
  }
  func.func @transform_3(%arg0: i32) -> (i32, i32) {
    %c0_i32 = arith.constant 0 : i32
    %c0_i32_0 = arith.constant 0 : i32
    %c0_i32_1 = arith.constant 0 : i32
    return %c0_i32, %c0_i32_0 : i32, i32
  }
  func.func @transform_4(%arg0: i32) -> (i32, i32) {
    %c0_i32 = arith.constant 0 : i32
    %c0_i32_0 = arith.constant 0 : i32
    %c0_i32_1 = arith.constant 0 : i32
    return %c0_i32, %c0_i32_0 : i32, i32
  }
  func.func @transform_5(%arg0: i32) -> (i32, i32) {
    %c0_i32 = arith.constant 0 : i32
    %c0_i32_0 = arith.constant 0 : i32
    %c0_i32_1 = arith.constant 0 : i32
    return %c0_i32, %c0_i32_0 : i32, i32
  }
  func.func @transform_6(%arg0: i32) -> (i32, i32) {
    %c0_i32 = arith.constant 0 : i32
    %c0_i32_0 = arith.constant 0 : i32
    %c0_i32_1 = arith.constant 0 : i32
    return %c0_i32, %c0_i32_0 : i32, i32
  }
  func.func @transform_7(%arg0: i32) -> (i32, i32) {
    %c0_i32 = arith.constant 0 : i32
    %c0_i32_0 = arith.constant 0 : i32
    return %arg0, %c0_i32 : i32, i32
  }
}

</mosaic_0001>

<bundles_post_ra>
// kernel: dqn_forward.1
= control target key start
LH: loop header
LB: loop body
LE: loop exit
PB: predicated region body
PF: predicated region fallthrough
CT: control target
= control target key end

     0   :  { %12 = vsyncpa [#allocation3], 0  ;;  %s600_s0 = inlined_call_operand.vmem [shape: f32[8,4], index: 0, kind: input, shape index: {}]   ;;  %s601_s1 = inlined_call_operand.vmem [shape: f32[4,128], index: 1, kind: input, shape index: {}]   ;;  %s602_s2 = inlined_call_operand.hbm [shape: bf16[128,128], index: 2, kind: input, shape index: {}]   ;;  %s603_s3 = inlined_call_operand.hbm [shape: bf16[128,128], index: 3, kind: input, shape index: {}]   ;;  %s604_s4 = inlined_call_operand.vmem [shape: f32[1,128], index: 4, kind: input, shape index: {}]   ;;  %s605_s5 = inlined_call_operand.vmem [shape: f32[1,128], index: 5, kind: input, shape index: {}]   ;;  %s606_s6 = inlined_call_operand.vmem [shape: f32[1,2], index: 6, kind: input, shape index: {}]   ;;  %s607_s7 = inlined_call_operand.vmem [shape: f32[8,2], index: 7, kind: output, shape index: {}]  }
   0x1   :  { %13 = vsyncpa [#allocation5], 0  ;;  %s499_s24 = smov [#allocation2]  }
   0x2   :  { %s23_s25 = sshll.u32 %s499_s24, 4  ;;  %s24_s25 = int_to_ptr.vmem [resolvable:$true] %s23_s25 }
   0x3   :  { %s463_s26 = scalar_lea.vmem %s24_s25, 1024  ;;  %p468_p1 = scmp.lt.s32.totalorder %s24_s25, %s24_s25 }
   0x4   :  { %p464_p0 = scmp.ne.s32.totalorder %s24_s25, %s463_s26  ;;  %p469_p2 = scmp.lt.s32.totalorder %s463_s26, %s463_s26 }
   0x6   :  { %p470_p3 = por %p469_p2, %p468_p1 }
   0x8   :  { %p471_p4 = pnand %p470_p3, %p464_p0 }
   0xa   :  { %474 = shalt.err (!%p471_p4)
}
   0xb   :  { %s500_s27 = smov 64   ;;  %s501_s28 = smov 4  }
   0xc   :  { %29 = dma.hbm_to_vmem [thread:$0]  %s602_s2, 1024, %s24_s25, [#allocation3], %s500_s27, %s500_s27, %s501_s28  }
   0xd   :  { %s502_s8 = smov [#allocation4]  }
   0xe   :  { %s35_s9 = sshll.u32 %s502_s8, 4  ;;  %s36_s9 = int_to_ptr.vmem [resolvable:$true] %s35_s9 }
   0xf   :  { %s483_s10 = scalar_lea.vmem %s36_s9, 1024  ;;  %p488_p6 = scmp.lt.s32.totalorder %s36_s9, %s36_s9 }
  0x10   :  { %p484_p5 = scmp.ne.s32.totalorder %s36_s9, %s483_s10  ;;  %p489_p7 = scmp.lt.s32.totalorder %s483_s10, %s483_s10 }
  0x12   :  { %p490_p8 = por %p489_p7, %p488_p6 }
  0x14   :  { %p491_p9 = pnand %p490_p8, %p484_p5 }
  0x16   :  { %494 = shalt.err (!%p491_p9)
}
  0x17   :  { %41 = dma.hbm_to_vmem [thread:$0]  %s603_s3, 1024, %s36_s9, [#allocation5], %s500_s27, %s500_s27, %s501_s28  }
  0x18   :  { %495 = dma.done.wait [#allocation3], 1024  }
  0x19   :  { %496 = vsyncadd [#allocation3], 4294966272 }
  0x1a   :  { %497 = dma.done.wait [#allocation5], 1024  }
  0x1b   :  { %498 = vsyncadd [#allocation5], 4294966272  ;;  %v503_v0 = vmov 0   ;;  %v504_v1 = vmov 2   ;;  %v505_v2 = vmov 0.0   ;;  %v55_v3 = vld [vmem:[%s600_s0] sm:$0xff] }
  0x1c   :  { %434 = vset.pattern.permute.xlu0 %v503_v0  ;;  %436 = vset.pattern.permute.xlu1 %v504_v1  ;;  %v439_v4 = vld [vmem:[#allocation2 + $0x38] sm:$0xff]   ;;  %v440_v5 = vld [vmem:[#allocation2 + $0x30] sm:$0xff]   ;;  %v506_v6 = vmov 1   ;;  %v507_v7 = vmov 3   ;;  %v441_v8 = vld [vmem:[#allocation2 + $0x28] sm:$0xff]   ;;  %vm508_vm0 = vmmov 0  }
  0x1d   :  { %384 = vmatprep.subr.bf16.mxu0 %v505_v2  ;;  %404 = vmatprep.subr.bf16.mxu1 %v505_v2  ;;  %v442_v9 = vld [vmem:[#allocation2 + $0x20] sm:$0xff]   ;;  %v447_v10 = vld [vmem:[#allocation4 + $0x38] sm:$0xff]   ;;  %v448_v12 = vld [vmem:[#allocation4 + $0x30] sm:$0xff]   ;;  %vm335_vm1 = vcmask 15360  }
  0x1e   :  { %60 = vperm.xlu0 %434, %v55_v3   ;;  %88 = vperm.xlu1 %436, %v55_v3   ;;  %v443_v11 = vld [vmem:[#allocation2 + $0x18] sm:$0xff]   ;;  %v444_v13 = vld [vmem:[#allocation2 + $0x10] sm:$0xff]   ;;  %v449_v14 = vld [vmem:[#allocation4 + $0x28] sm:$0xff]  }
  0x1f   :  { %385 = vmatpush3.bf16.msra.mxu0 %v439_v4  ;;  %400 = vmatprep.mubr.msk.bf16.mxu0 %vm508_vm0, %v505_v2  ;;  %v445_v15 = vld [vmem:[#allocation2 + $0x8] sm:$0xff]   ;;  %v450_v16 = vld [vmem:[#allocation4 + $0x20] sm:$0xff]   ;;  %v451_v18 = vld [vmem:[#allocation4 + $0x18] sm:$0xff]  }
  0x20   :  { %386 = vmatprep.subr.bf16.mxu0 %v505_v2  ;;  %420 = vmatprep.mubr.msk.bf16.mxu1 %vm508_vm0, %v505_v2  ;;  %v446_v17 = vld [vmem:[#allocation2] sm:$0xff]   ;;  %v452_v19 = vld [vmem:[#allocation4 + $0x10] sm:$0xff]   ;;  %v453_v39 = vld [vmem:[#allocation4 + $0x8] sm:$0xff]  }
  0x21   :  { %405 = vmatpush3.bf16.msra.mxu1 %v447_v10  ;;  %v343_v20 = vld [vmem:[%s601_s1] ss:$0 sm:$0xff]  ;;  %v345_v25 = vld [vmem:[%s601_s1 + $0x1] ss:$0 sm:$0xff]  ;;  %v346_v26 = vld [vmem:[%s601_s1 + $0x2] ss:$0 sm:$0xff] }
  0x22   :  { %435 = vset.pattern.permute.xlu0 %v506_v6  ;;  %437 = vset.pattern.permute.xlu1 %v507_v7  ;;  %v344_v24 = vld [vmem:[%s604_s4] ss:$0 sm:$0xff]  ;;  %v347_v28 = vld [vmem:[%s601_s1 + $0x3] ss:$0 sm:$0xff] }
  0x23   :  { %77 = vperm.xlu0 %435, %v55_v3   ;;  %99 = vperm.xlu1 %437, %v55_v3   ;;  %v454_v40 = vld [vmem:[#allocation4] sm:$0xff]  }
  0x24   :  { %387 = vmatpush3.bf16.msra.mxu0 %v440_v5  ;;  %406 = vmatprep.subr.bf16.mxu1 %v505_v2  ;;  %v348_v41 = vld [vmem:[%s605_s5] ss:$0 sm:$0xff] }
  0x25   :  { %388 = vmatprep.subr.bf16.mxu0 %v505_v2  ;;  %407 = vmatpush3.bf16.msra.mxu1 %v448_v12  ;;  %v365_v49 = vld [vmem:[%s606_s6] ss:$0 sm:$0xff] }
  0x26   :  { %408 = vmatprep.subr.bf16.mxu1 %v505_v2 }
  0x27   :  { %438 = vset.pattern.permute.xlu0 %v507_v7 }
  0x28   :  { %389 = vmatpush3.bf16.msra.mxu0 %v441_v8 }
  0x29   :  { %390 = vmatprep.subr.bf16.mxu0 %v505_v2  ;;  %409 = vmatpush3.bf16.msra.mxu1 %v449_v14 }
  0x2a   :  { %410 = vmatprep.subr.bf16.mxu1 %v505_v2 }
  0x2c   :  { %391 = vmatpush3.bf16.msra.mxu0 %v442_v9 }
  0x2d   :  { %392 = vmatprep.subr.bf16.mxu0 %v505_v2  ;;  %411 = vmatpush3.bf16.msra.mxu1 %v450_v16 }
  0x2e   :  { %412 = vmatprep.subr.bf16.mxu1 %v505_v2 }
  0x30   :  { %393 = vmatpush3.bf16.msra.mxu0 %v443_v11 }
  0x31   :  { %394 = vmatprep.subr.bf16.mxu0 %v505_v2  ;;  %413 = vmatpush3.bf16.msra.mxu1 %v451_v18 }
  0x32   :  { %414 = vmatprep.subr.bf16.mxu1 %v505_v2 }
  0x34   :  { %395 = vmatpush3.bf16.msra.mxu0 %v444_v13 }
  0x35   :  { %396 = vmatprep.subr.bf16.mxu0 %v505_v2  ;;  %415 = vmatpush3.bf16.msra.mxu1 %v452_v19 }
  0x36   :  { %416 = vmatprep.subr.bf16.mxu1 %v505_v2 }
  0x38   :  { %397 = vmatpush3.bf16.msra.mxu0 %v445_v15 }
  0x39   :  { %398 = vmatprep.subr.bf16.mxu0 %v505_v2  ;;  %417 = vmatpush3.bf16.msra.mxu1 %v453_v39 }
  0x3a   :  { %418 = vmatprep.subr.bf16.mxu1 %v505_v2 }
  0x3c   :  { %399 = vmatpush3.bf16.msra.mxu0 %v446_v17 }
  0x3d   :  { %419 = vmatpush3.bf16.msra.mxu1 %v454_v40 }
  0x99   :  { %v61_v21 = vpop.permute.xlu0 %60  ;;  %v89_v22 = vpop.permute.xlu1 %88 }
  0x9a   :  { %v67_v23 = vmul.f32 %v343_v20, %v61_v21  ;;  %v95_v32 = vmul.f32 %v346_v26, %v89_v22 }
  0x9c   :  { %v74_v30 = vadd.f32 %v344_v24, %v67_v23 }
  0x9e   :  { %v78_v27 = vpop.permute.xlu0 %77  ;;  %v100_v29 = vpop.permute.xlu1 %99 }
  0x9f   :  { %v84_v31 = vmul.f32 %v345_v25, %v78_v27  ;;  %v106_v34 = vmul.f32 %v347_v28, %v100_v29 }
  0xa1   :  { %v85_v33 = vadd.f32 %v84_v31, %v74_v30 }
  0xa3   :  { %v96_v35 = vadd.f32 %v95_v32, %v85_v33 }
  0xa5   :  { %v107_v36 = vadd.f32 %v106_v34, %v96_v35 }
  0xa7   :  { %v108_v37 = vmax.f32 %v107_v36, 0.0 }
  0xa9   :  { %v109_v38 = vpack.c.bf16 %v108_v37, %v108_v37 }
  0xab   :  { %401 = vmatmul.mubr.bf16.vlgmr.msra.gmra.mxu0 %v109_v38 }
 0x16b   :  { %v215_v42 = vpop.f32.mrf.mxu0 }
 0x16c   :  { %v216_v43 = vadd.f32 %v348_v41, %v215_v42 }
 0x16d   :  { %v402_v44 = vpop.f32.mrf.mxu0 }
 0x16e   :  { %v221_v45 = vmax.f32 %v216_v43, 0.0 }
 0x16f   :  { %v218_v46 = vpop.f32.mrf.mxu0 }
 0x170   :  { %v222_v47 = vpack.c.bf16 %v221_v45, %v221_v45 }
 0x171   :  { %v403_v48 = vpop.f32.mrf.mxu0 }
 0x172   :  { %421 = vmatmul.mubr.bf16.vlgmr.msra.gmra.mxu1 %v222_v47 }
 0x232   :  { %v321_v50 = vpop.f32.mrf.mxu1 }
 0x233   :  { %v334_v51 = vadd.f32 %v365_v49, %v321_v50 }
 0x234   :  { %v422_v52 = vpop.f32.mrf.mxu1 }
 0x235   :  { %336 = vst.msk [vmem:[%s607_s7] sm:$0xff] %vm335_vm1, %v334_v51 }
 0x236   :  { %v324_v53 = vpop.f32.mrf.mxu1 }
 0x238   :  { %v423_v54 = vpop.f32.mrf.mxu1 }
 0x239   :  { %341 = vsyncpa [#allocation3], 1 }
 0x23a   :  { %342 = vsyncpa [#allocation5], 1 }

</bundles_post_ra>
